<compile_context>
chip_gen: v6e
topology: v6e:2x2x1
jax: 0.10.0
libtpu: 0.0.40
codegen_flags: <defaults>
</compile_context>

<pallas_src>
import jax
import jax.numpy as jnp
from jax import lax
from jax.experimental import pallas as pl
from jax.experimental.pallas import tpu as pltpu

EPS = 1e-5


def _round_up(n, m):
    return (n + m - 1) // m * m


def prenorm_kernel(x_ref, gamma_ref, beta_ref, w_ref, bias_ref, o_ref, y_ref):
    # x_ref:     (TM, D)   input rows (same block for every j -> fetched once)
    # gamma_ref: (1, D)    f32
    # beta_ref:  (1, D)    f32
    # w_ref:     (D, TN)   fn weight column tile, native dtype (bf16/f32)
    # bias_ref:  (1, TN)   f32
    # o_ref:     (TM, TN)  output tile
    # y_ref:     (TM, D)   VMEM scratch: normalized rows in w's dtype
    j = pl.program_id(1)

    @pl.when(j == 0)
    def _():
        x = x_ref[...].astype(jnp.float32)
        inv_d = jnp.float32(1.0 / x.shape[-1])
        # One-pass mean / (biased) variance: one fewer XLU reduction + VPU pass.
        s1 = jnp.sum(x, axis=-1, keepdims=True)
        s2 = jnp.sum(x * x, axis=-1, keepdims=True)
        mean = s1 * inv_d
        var = s2 * inv_d - mean * mean
        xn = (x - mean) * lax.rsqrt(var + EPS)          # rsqrt -> EUP slot
        y = xn * gamma_ref[...] + beta_ref[...]
        y_ref[...] = y.astype(y_ref.dtype)

    # fn = Linear(D, D): MXU matmul in the weight's native dtype, f32 accumulate.
    out = jnp.dot(y_ref[...], w_ref[...], preferred_element_type=jnp.float32)
    out = out + bias_ref[...]
    o_ref[...] = out.astype(o_ref.dtype)


def _pick_tile_n(d):
    for cand in (512, 256, 128):
        if d % cand == 0:
            return cand
    return d  # small D: use the full lane extent


def prenorm(x, gamma, beta, w, bias, *, tile_rows=256, tile_n=None):
    """fn(LayerNorm(x)) for x: (B, S, D), fn = Linear(D, D)."""
    B, S, D = x.shape
    rows = B * S

    tn = tile_n if tile_n is not None else _pick_tile_n(D)
    assert D % tn == 0, "D must be divisible by the column tile"

    # Row tile: big (MXU-friendly), clamped for tiny inputs, 16-aligned.
    tm = min(tile_rows, _round_up(rows, 16))
    padded_rows = _round_up(rows, tm)

    x2 = x.reshape(rows, D)
    if padded_rows != rows:
        x2 = jnp.pad(x2, ((0, padded_rows - rows), (0, 0)))

    # Pre-cast resident params to f32 once in the wrapper (no in-kernel recasts).
    gamma2 = gamma.reshape(1, D).astype(jnp.float32)
    beta2 = beta.reshape(1, D).astype(jnp.float32)
    bias2 = bias.reshape(1, D).astype(jnp.float32)

    grid = (padded_rows // tm, D // tn)

    # Explicit VMEM budget: double-buffered streams + resident scratch, with
    # headroom, capped at the v7x 64 MiB physical VMEM.
    xb = jnp.dtype(x.dtype).itemsize
    wb = jnp.dtype(w.dtype).itemsize
    needed = (2 * tm * D * xb          # x tiles (double-buffered)
              + tm * D * wb            # normalized-rows scratch
              + 2 * D * tn * wb        # weight column tiles
              + 2 * tm * tn * xb       # output tiles
              + 6 * D * 4)             # gamma/beta/bias
    vmem_limit = min(max(2 * needed, 32 * 1024 * 1024), 64 * 1024 * 1024)

    out = pl.pallas_call(
        prenorm_kernel,
        out_shape=jax.ShapeDtypeStruct((padded_rows, D), x.dtype),
        grid_spec=pltpu.PrefetchScalarGridSpec(
            num_scalar_prefetch=0,
            grid=grid,
            in_specs=[
                pl.BlockSpec((tm, D), lambda i, j: (i, 0)),   # x rows (resident over j)
                pl.BlockSpec((1, D), lambda i, j: (0, 0)),    # gamma
                pl.BlockSpec((1, D), lambda i, j: (0, 0)),    # beta
                pl.BlockSpec((D, tn), lambda i, j: (0, j)),   # fn weight column tile
                pl.BlockSpec((1, tn), lambda i, j: (0, j)),   # fn bias column tile
            ],
            out_specs=pl.BlockSpec((tm, tn), lambda i, j: (i, j)),
            scratch_shapes=[pltpu.VMEM((tm, D), w.dtype)],
        ),
        compiler_params=pltpu.CompilerParams(
            dimension_semantics=("parallel", "arbitrary"),
            vmem_limit_bytes=vmem_limit,
        ),
    )(x2, gamma2, beta2, w, bias2)

    if padded_rows != rows:
        out = out[:rows]
    return out.reshape(B, S, D)


def reference(x, gamma, beta, w, bias):
    x32 = x.astype(jnp.float32)
    mean = jnp.mean(x32, axis=-1, keepdims=True)
    var = jnp.mean((x32 - mean) ** 2, axis=-1, keepdims=True)
    xn = (x32 - mean) / jnp.sqrt(var + EPS)
    y = xn * gamma.astype(jnp.float32) + beta.astype(jnp.float32)
    return (y @ w.astype(jnp.float32) + bias.astype(jnp.float32)).astype(x.dtype)


if __name__ == "__main__":
    key = jax.random.PRNGKey(0)
    B, S, D = 2, 8, 32

    kx, kw, kb = jax.random.split(key, 3)
    x = jax.random.normal(kx, (B, S, D), dtype=jnp.float32)

    # LayerNorm params: torch default init (gamma=1, beta=0)
    gamma = jnp.ones((D,), dtype=jnp.float32)
    beta = jnp.zeros((D,), dtype=jnp.float32)

    # fn = Linear(D, D), deterministic init
    w = jax.random.normal(kw, (D, D), dtype=jnp.float32) * (1.0 / jnp.sqrt(D))
    bias = jax.random.normal(kb, (D,), dtype=jnp.float32) * 0.01

    out = prenorm(x, gamma, beta, w, bias)
    jax.block_until_ready(out)

    ref = reference(x, gamma, beta, w, bias)
    assert jnp.allclose(out, ref, atol=2e-4, rtol=2e-4), "mismatch vs reference"

    print("KERNEL_OK")
</pallas_src>

<mosaic_0001>
module attributes {stable_mosaic.version = 11 : i64} {
  func.func @prenorm_kernel(%arg0: i32, %arg1: i32, %arg2: memref<16x32xf32, #tpu.memory_space<vmem>>, %arg3: memref<1x32xf32, #tpu.memory_space<vmem>>, %arg4: memref<1x32xf32, #tpu.memory_space<vmem>>, %arg5: memref<32x32xf32, #tpu.memory_space<vmem>>, %arg6: memref<1x32xf32, #tpu.memory_space<vmem>>, %arg7: memref<16x32xf32, #tpu.memory_space<vmem>>, %arg8: memref<16x32xf32, #tpu.memory_space<vmem>>) attributes {dimension_semantics = [#tpu.dimension_semantics<parallel>, #tpu.dimension_semantics<arbitrary>], iteration_bounds = array<i64: 1, 1>, scalar_prefetch = 0 : i64, scratch_operands = 1 : i64, tpu.core_type = #tpu.core_type<tc>, window_params = [{transform_indices = @transform_0, window_bounds = array<i64: 16, 32>}, {pipeline_mode = #tpu.pipeline_mode<synchronous>, transform_indices = @transform_1, window_bounds = array<i64: 1, 32>}, {pipeline_mode = #tpu.pipeline_mode<synchronous>, transform_indices = @transform_2, window_bounds = array<i64: 1, 32>}, {transform_indices = @transform_3, window_bounds = array<i64: 32, 32>}, {transform_indices = @transform_4, window_bounds = array<i64: 1, 32>}, {transform_indices = @transform_5, window_bounds = array<i64: 16, 32>}]} {
    %c0_i32 = arith.constant 0 : i32
    %0 = arith.cmpi eq, %arg1, %c0_i32 : i32
    %1 = arith.extui %0 : i1 to i32
    %c0_i32_0 = arith.constant 0 : i32
    %2 = arith.cmpi ne, %1, %c0_i32_0 : i32
    scf.if %2 {
      %c0_8 = arith.constant 0 : index
      %c0_9 = arith.constant 0 : index
      %10 = vector.load %arg2[%c0_8, %c0_9] : memref<16x32xf32, #tpu.memory_space<vmem>>, vector<16x32xf32>
      %cst_10 = arith.constant dense<0.000000e+00> : vector<16xf32>
      %11 = vector.multi_reduction <add>, %10, %cst_10 [1] : vector<16x32xf32> to vector<16xf32>
      %12 = vector.shape_cast %11 : vector<16xf32> to vector<16x1xf32>
      %13 = arith.mulf %10, %10 : vector<16x32xf32>
      %cst_11 = arith.constant dense<0.000000e+00> : vector<16xf32>
      %14 = vector.multi_reduction <add>, %13, %cst_11 [1] : vector<16x32xf32> to vector<16xf32>
      %15 = vector.shape_cast %14 : vector<16xf32> to vector<16x1xf32>
      %cst_12 = arith.constant 3.125000e-02 : f32
      %16 = vector.broadcast %cst_12 : f32 to vector<16x1xf32>
      %17 = arith.mulf %12, %16 : vector<16x1xf32>
      %cst_13 = arith.constant 3.125000e-02 : f32
      %18 = vector.broadcast %cst_13 : f32 to vector<16x1xf32>
      %19 = arith.mulf %15, %18 : vector<16x1xf32>
      %20 = arith.mulf %17, %17 : vector<16x1xf32>
      %21 = arith.subf %19, %20 : vector<16x1xf32>
      %22 = vector.broadcast %17 : vector<16x1xf32> to vector<16x32xf32>
      %23 = arith.subf %10, %22 : vector<16x32xf32>
      %cst_14 = arith.constant 9.99999974E-6 : f32
      %24 = vector.broadcast %cst_14 : f32 to vector<16x1xf32>
      %25 = arith.addf %21, %24 : vector<16x1xf32>
      %26 = math.rsqrt %25 : vector<16x1xf32>
      %27 = vector.broadcast %26 : vector<16x1xf32> to vector<16x32xf32>
      %28 = arith.mulf %23, %27 : vector<16x32xf32>
      %c0_15 = arith.constant 0 : index
      %c0_16 = arith.constant 0 : index
      %29 = vector.load %arg3[%c0_15, %c0_16] : memref<1x32xf32, #tpu.memory_space<vmem>>, vector<1x32xf32>
      %30 = vector.broadcast %29 : vector<1x32xf32> to vector<16x32xf32>
      %31 = arith.mulf %28, %30 : vector<16x32xf32>
      %c0_17 = arith.constant 0 : index
      %c0_18 = arith.constant 0 : index
      %32 = vector.load %arg4[%c0_17, %c0_18] : memref<1x32xf32, #tpu.memory_space<vmem>>, vector<1x32xf32>
      %33 = vector.broadcast %32 : vector<1x32xf32> to vector<16x32xf32>
      %34 = arith.addf %31, %33 : vector<16x32xf32>
      %c0_19 = arith.constant 0 : index
      %c0_20 = arith.constant 0 : index
      %35 = vector.load %arg8[%c0_19, %c0_20] : memref<16x32xf32, #tpu.memory_space<vmem>>, vector<16x32xf32>
      tpu.vector_store %arg8[%c0_19, %c0_20], %34 {strides = array<i32>} : memref<16x32xf32, #tpu.memory_space<vmem>>, vector<16x32xf32>,
    } else {
    }
    %c0 = arith.constant 0 : index
    %c0_1 = arith.constant 0 : index
    %3 = vector.load %arg8[%c0, %c0_1] : memref<16x32xf32, #tpu.memory_space<vmem>>, vector<16x32xf32>
    %c0_2 = arith.constant 0 : index
    %c0_3 = arith.constant 0 : index
    %4 = vector.load %arg5[%c0_2, %c0_3] : memref<32x32xf32, #tpu.memory_space<vmem>>, vector<32x32xf32>
    %cst = arith.constant dense<0.000000e+00> : vector<16x32xf32>
    %5 = tpu.matmul %3, %4, %cst {dimension_numbers = #tpu.dot_dimension_numbers<[1], [0], [0], [1], [0, 0, 1, 1], [], []>} : vector<16x32xf32>, vector<32x32xf32>, vector<16x32xf32> -> vector<16x32xf32>
    %c0_4 = arith.constant 0 : index
    %c0_5 = arith.constant 0 : index
    %6 = vector.load %arg6[%c0_4, %c0_5] : memref<1x32xf32, #tpu.memory_space<vmem>>, vector<1x32xf32>
    %7 = vector.broadcast %6 : vector<1x32xf32> to vector<16x32xf32>
    %8 = arith.addf %5, %7 : vector<16x32xf32>
    %c0_6 = arith.constant 0 : index
    %c0_7 = arith.constant 0 : index
    %9 = vector.load %arg7[%c0_6, %c0_7] : memref<16x32xf32, #tpu.memory_space<vmem>>, vector<16x32xf32>
    tpu.vector_store %arg7[%c0_6, %c0_7], %8 {strides = array<i32>} : memref<16x32xf32, #tpu.memory_space<vmem>>, vector<16x32xf32>,
    return
  }
  func.func @transform_0(%arg0: i32, %arg1: i32) -> (i32, i32) {
    %c0_i32 = arith.constant 0 : i32
    %c0_i32_0 = arith.constant 0 : i32
    return %arg0, %c0_i32 : i32, i32
  }
  func.func @transform_1(%arg0: i32, %arg1: i32) -> (i32, i32) {
    %c0_i32 = arith.constant 0 : i32
    %c0_i32_0 = arith.constant 0 : i32
    %c0_i32_1 = arith.constant 0 : i32
    return %c0_i32, %c0_i32_0 : i32, i32
  }
  func.func @transform_2(%arg0: i32, %arg1: i32) -> (i32, i32) {
    %c0_i32 = arith.constant 0 : i32
    %c0_i32_0 = arith.constant 0 : i32
    %c0_i32_1 = arith.constant 0 : i32
    return %c0_i32, %c0_i32_0 : i32, i32
  }
  func.func @transform_3(%arg0: i32, %arg1: i32) -> (i32, i32) {
    %c0_i32 = arith.constant 0 : i32
    %c0_i32_0 = arith.constant 0 : i32
    return %c0_i32, %arg1 : i32, i32
  }
  func.func @transform_4(%arg0: i32, %arg1: i32) -> (i32, i32) {
    %c0_i32 = arith.constant 0 : i32
    %c0_i32_0 = arith.constant 0 : i32
    return %c0_i32, %arg1 : i32, i32
  }
  func.func @transform_5(%arg0: i32, %arg1: i32) -> (i32, i32) {
    %c0_i32 = arith.constant 0 : i32
    return %arg0, %arg1 : i32, i32
  }
}

</mosaic_0001>

<bundles_post_ra>
// kernel: tpu_custom_call.1
= control target key start
LH: loop header
LB: loop body
LE: loop exit
PB: predicated region body
PF: predicated region fallthrough
CT: control target
= control target key end

     0   :  { %10 = vsyncpa [#allocation4], 0  ;;  %s390_s0 = inlined_call_operand.hbm [shape: f32[16,32], index: 0, kind: input, shape index: {}]   ;;  %s391_s1 = inlined_call_operand.vmem [shape: f32[1,32], index: 1, kind: input, shape index: {}]   ;;  %s392_s2 = inlined_call_operand.vmem [shape: f32[1,32], index: 2, kind: input, shape index: {}]   ;;  %s393_s3 = inlined_call_operand.hbm [shape: f32[32,32], index: 3, kind: input, shape index: {}]   ;;  %s394_s4 = inlined_call_operand.vmem [shape: f32[1,32], index: 4, kind: input, shape index: {}]   ;;  %s395_s5 = inlined_call_operand.hbm [shape: f32[16,32], index: 5, kind: output, shape index: {}]  }
   0x1   :  { %11 = vsyncpa [#allocation7], 0 }
   0x2   :  { %12 = vsyncpa [#allocation5], 0  ;;  %s318_s18 = smov [#allocation3]  }
   0x3   :  { %s18_s19 = sshll.u32 %s318_s18, 4  ;;  %s19_s19 = int_to_ptr.vmem [resolvable:$true] %s18_s19 }
   0x4   :  { %s260_s20 = scalar_lea.vmem %s19_s19, 256  ;;  %p265_p1 = scmp.lt.s32.totalorder %s19_s19, %s19_s19 }
   0x5   :  { %p261_p0 = scmp.ne.s32.totalorder %s19_s19, %s260_s20  ;;  %p266_p2 = scmp.lt.s32.totalorder %s260_s20, %s260_s20 }
   0x7   :  { %p267_p3 = por %p266_p2, %p265_p1 }
   0x9   :  { %p268_p4 = pnand %p267_p3, %p261_p0 }
   0xb   :  { %271 = shalt.err (!%p268_p4)
}
   0xc   :  { %s319_s21 = smov 128   ;;  %s320_s22 = smov 8  }
   0xd   :  { %24 = dma.hbm_to_vmem [thread:$0]  %s390_s0, 256, %s19_s19, [#allocation4], %s319_s21, %s319_s21, %s320_s22  }
   0xe   :  { %s321_s25 = smov [#allocation6]  }
   0xf   :  { %s34_s26 = sshll.u32 %s321_s25, 4  ;;  %s35_s26 = int_to_ptr.vmem [resolvable:$true] %s34_s26 }
  0x10   :  { %s280_s27 = scalar_lea.vmem %s35_s26, 512  ;;  %p285_p6 = scmp.lt.s32.totalorder %s35_s26, %s35_s26 }
  0x11   :  { %p281_p5 = scmp.ne.s32.totalorder %s35_s26, %s280_s27  ;;  %p286_p7 = scmp.lt.s32.totalorder %s280_s27, %s280_s27 }
  0x13   :  { %p287_p8 = por %p286_p7, %p285_p6 }
  0x15   :  { %p288_p9 = pnand %p287_p8, %p281_p5 }
  0x17   :  { %291 = shalt.err (!%p288_p9)
}
  0x18   :  { %40 = dma.hbm_to_vmem [thread:$0]  %s393_s3, 512, %s35_s26, [#allocation7], %s319_s21, %s319_s21, %s320_s22  }
  0x19   :  { %312 = dma.done.wait [#allocation4], 256  }
  0x1a   :  { %313 = vsyncadd [#allocation4], 4294967040 }
  0x1b   :  { %314 = dma.done.wait [#allocation7], 512  }
  0x1c   :  { %315 = vsyncadd [#allocation7], 4294966784  ;;  %vm55_vm0 = vcmask 261120   ;;  %v53_v0 = vld [vmem:[#allocation3] sm:$0xff]  ;;  %v54_v1 = vld [vmem:[#allocation3 + $0x8] sm:$0xff] }
  0x1d   :  { %v56_v2 = vsel %vm55_vm0, %v53_v0, 0.0  ;;  %v62_v3 = vmul.f32 %v53_v0, %v53_v0  ;;  %v63_v4 = vmul.f32 %v54_v1, %v54_v1  ;;  %v59_v6 = vsel %vm55_vm0, %v54_v1, 0.0  ;;  %v111_v8 = vld [vmem:[#allocation6 + $0x18] sm:$0xff]  ;;  %v110_v9 = vld [vmem:[#allocation6 + $0x10] sm:$0xff]  ;;  %v109_v10 = vld [vmem:[#allocation6 + $0x8] sm:$0xff] }
  0x1e   :  { %57 = vadd.xlane.f32.xlu0 %v56_v2  ;;  %232 = vmatprep.subr.mxu0 %v111_v8  ;;  %v108_v11 = vld [vmem:[#allocation6] sm:$0xff] }
  0x1f   :  { %v64_v5 = vsel %vm55_vm0, %v62_v3, 0.0  ;;  %v67_v7 = vsel %vm55_vm0, %v63_v4, 0.0  ;;  %233 = vmatpush3.msra.mxu0 %v111_v8  ;;  %v221_v28 = vld [vmem:[%s391_s1] ss:$0 sm:$0xff] }
  0x20   :  { %65 = vadd.xlane.f32.xlu1 %v64_v5  ;;  %234 = vmatprep.subr.mxu0 %v110_v9  ;;  %v222_v30 = vld [vmem:[%s392_s2] ss:$0 sm:$0xff]  ;;  %s322_s2 = smov [#allocation8]  }
  0x21   :  { %235 = vmatpush3.msra.mxu0 %v110_v9  ;;  %v223_v40 = vld [vmem:[%s394_s4] ss:$0 sm:$0xff]  ;;  %s208_s8 = sshll.u32 %s322_s2, 4  ;;  %s209_s8 = int_to_ptr.vmem [resolvable:$true] %s208_s8 }
  0x22   :  { %60 = vadd.xlane.f32.xlu0 %v59_v6  ;;  %236 = vmatprep.subr.mxu0 %v109_v10  ;;  %s292_s9 = scalar_lea.vmem %s209_s8, 256  ;;  %p297_p11 = scmp.lt.s32.totalorder %s209_s8, %s209_s8 }
  0x23   :  { %237 = vmatpush3.msra.mxu0 %v109_v10  ;;  %p293_p10 = scmp.ne.s32.totalorder %s209_s8, %s292_s9  ;;  %p298_p12 = scmp.lt.s32.totalorder %s292_s9, %s292_s9 }
  0x24   :  { %68 = vadd.xlane.f32.xlu1 %v67_v7  ;;  %238 = vmatprep.subr.mxu0 %v108_v11 }
  0x25   :  { %239 = vmatpush3.msra.mxu0 %v108_v11  ;;  %p299_p13 = por %p298_p12, %p297_p11 }
  0x27   :  { %p300_p0 = pnand %p299_p13, %p293_p10 }
  0xa7   :  { %v58_v12 = vpop.xlane.xlu0 %57 }
  0xa8   :  { %v70_v13 = vmul.f32 0.03125, %v58_v12 }
  0xa9   :  { %v66_v14 = vpop.xlane.xlu1 %65 }
  0xaa   :  { %v74_v15 = vmul.f32 %v70_v13, %v70_v13  ;;  %v72_v16 = vmul.f32 0.03125, %v66_v14  ;;  %v78_v26 = vsub.f32 %v53_v0, %v70_v13 }
  0xab   :  { %v61_v17 = vpop.xlane.xlu0 %60 }
  0xac   :  { %v76_v18 = vsub.f32 %v72_v16, %v74_v15  ;;  %v71_v19 = vmul.f32 0.03125, %v61_v17 }
  0xad   :  { %v69_v20 = vpop.xlane.xlu1 %68 }
  0xae   :  { %v80_v21 = vadd.f32 1e-05, %v76_v18  ;;  %v75_v22 = vmul.f32 %v71_v19, %v71_v19  ;;  %v73_v23 = vmul.f32 0.03125, %v69_v20  ;;  %v79_v32 = vsub.f32 %v54_v1, %v71_v19 }
  0xb0   :  { %248 = vrsqrt.f32 %v80_v21  ;;  %v77_v24 = vsub.f32 %v73_v23, %v75_v22 }
  0xb2   :  { %v81_v25 = vadd.f32 1e-05, %v77_v24 }
  0xb4   :  { %250 = vrsqrt.f32 %v81_v25 }
  0xbd   :  { %v249_v27 = vpop.eup %248 }
  0xbe   :  { %v84_v29 = vmul.f32 %v249_v27, %v78_v26 }
  0xc0   :  { %v93_v31 = vmul.f32 %v221_v28, %v84_v29 }
  0xc1   :  { %v251_v33 = vpop.eup %250 }
  0xc2   :  { %v102_v34 = vadd.f32 %v222_v30, %v93_v31  ;;  %v85_v35 = vmul.f32 %v251_v33, %v79_v32 }
  0xc4   :  { %104 = vst.msk [vmem:[#allocation2] sm:$0xff] %vm55_vm0, %v102_v34  ;;  %v94_v36 = vmul.f32 %v221_v28, %v85_v35 }
  0xc6   :  { %v103_v37 = vadd.f32 %v222_v30, %v94_v36 }
  0xc8   :  { %105 = vst.msk [vmem:[#allocation2 + $0x8] sm:$0xff] %vm55_vm0, %v103_v37 }
  0xcb   :  { %v106_v38 = vld [vmem:[#allocation2] sm:$0xff] }
  0xcc   :  { %240 = vmatprep.mubr.msk.f32.mxu0 %vm55_vm0, %v106_v38 }
  0xcf   :  { %v107_v39 = vld [vmem:[#allocation2 + $0x8] sm:$0xff] }
  0xd0   :  { %241 = vmatmul.mubr.msk.f32.vlgmr.msra.gmra.mxu0 %vm55_vm0, %v107_v39 }
 0x190   :  { %v242_v41 = vpop.f32.mrf.mxu0 }
 0x191   :  { %v198_v42 = vadd.f32 %v242_v41, %v223_v40 }
 0x192   :  { %v192_v43 = vpop.f32.mrf.mxu0 }
 0x193   :  { %202 = vst.msk [vmem:[#allocation8 + $0x8] sm:$0xff] %vm55_vm0, %v198_v42  ;;  %v193_v44 = vadd.f32 %v223_v40, %v192_v43 }
 0x195   :  { %201 = vst.msk [vmem:[#allocation8] sm:$0xff] %vm55_vm0, %v193_v44 }
 0x196   :  { %303 = shalt.err (!%p300_p0)
}
 0x197   :  { %214 = dma.vmem_to_hbm [thread:$0]  %s209_s8, 256, %s395_s5, [#allocation5], %s319_s21, %s319_s21, %s320_s22  }
 0x198   :  { %316 = dma.done.wait [#allocation5], 256  }
 0x199   :  { %317 = vsyncadd [#allocation5], 4294967040 }
 0x19a   :  { %218 = vsyncpa [#allocation4], 1 }
 0x19b   :  { %219 = vsyncpa [#allocation7], 1 }
 0x19c   :  { %220 = vsyncpa [#allocation5], 1 }

</bundles_post_ra>
